<compile_context>
chip_gen: v7x
topology: tpu7x:2x2x1
jax: 0.10.0
libtpu: 0.0.40
codegen_flags: <defaults>
</compile_context>

<pallas_src>
import functools

import jax
import jax.numpy as jnp
from jax.experimental import pallas as pl
from jax.experimental.pallas import tpu as pltpu


# ----------------------------- helpers ------------------------------------ #

def _round_up(x, m):
    return ((x + m - 1) // m) * m


def _pad128(x):
    return _round_up(x, 128)


@functools.lru_cache(maxsize=1)
def _tpu_limits():
    """(physical VMEM bytes, fast-HBM generation?) for generation-aware tiling."""
    vmem_cap = 64 * (1 << 20)      # conservative default (v7x per-core VMEM)
    fast_hbm = False
    try:
        info = pltpu.get_tpu_info()
        cap = getattr(info, "vmem_capacity_bytes", None)
        if cap:
            vmem_cap = int(cap)
            # v7x: 64 MiB VMEM per TensorCore and ~3.2 TB/s HBM -> larger per-step
            # traffic target to stay off the step-overhead floor.
            fast_hbm = vmem_cap <= 64 * (1 << 20)
    except Exception:
        pass
    return vmem_cap, fast_hbm


def _pick_tile_rows(n, f, p, h, g, itemsize, row_mult, fast_hbm, vmem_cap):
    """Row-tile size from a per-step HBM-traffic target, clamped by padded VMEM use."""
    hbm_row = (f + p + h) * itemsize                      # true streamed bytes / row
    out_lanes = h if g > 1 else _pad128(h)                # lane-dense packs H exactly
    vmem_row = 2 * ((_pad128(f) + (_pad128(p) if p else 0) + out_lanes) * itemsize)
    target = (8 if fast_hbm else 3) * (1 << 20)           # bytes streamed per grid step
    budget = min(vmem_cap // 2, 48 * (1 << 20))           # streamed-tile VMEM ceiling
    t = max(row_mult, target // max(1, hbm_row))
    t = min(t, max(row_mult, budget // max(1, vmem_row)))
    t = _round_up(t, row_mult)
    if t >= n:
        if n >= 4 * row_mult:
            # keep >= 2 grid steps so both TensorCores get work on v7x megacore
            t = _round_up((n + 1) // 2, row_mult)
        else:
            t = n
    return int(t)


def _vmem_limit_bytes(tile_n, f, p, h, g, itemsize, vmem_cap):
    """Padded-layout VMEM accounting (double-buffered tiles + resident weights)."""
    out_rows = tile_n // g if g > 1 else tile_n
    out_lanes = 128 if g > 1 else _pad128(h)
    streamed = 2 * tile_n * (_pad128(f) + (_pad128(p) if p else 0)) * itemsize
    streamed += 2 * out_rows * out_lanes * itemsize
    # weights/bias stay resident but are still double-buffered by the default pipeline
    # (we avoid pl.Buffered(1) for portability) -> account x2.
    k_rows = _round_up(f, 8) + (_round_up(p, 8) if p else 0)
    weights = 2 * (k_rows * _pad128(h) * itemsize + 8 * _pad128(h) * 4)
    total = streamed + weights
    ceiling = max(32 * (1 << 20), vmem_cap - 16 * (1 << 20))
    return int(min(ceiling, max(8 * (1 << 20), 2 * total)))


# ------------------------------ kernel ------------------------------------ #

def _node_encoder_kernel(*refs, h, g, has_pe):
    if has_pe:
        f_ref, pe_ref, wf_ref, wpe_ref, b_ref, o_ref = refs
    else:
        f_ref, wf_ref, b_ref, o_ref = refs
        pe_ref = wpe_ref = None

    w_dtype = wf_ref.dtype
    bias = b_ref[...].astype(jnp.float32)

    def rows_out(rows):
        if rows is None:
            x_f = f_ref[...]
            x_pe = pe_ref[...] if has_pe else None
        else:
            x_f = f_ref[rows, :]
            x_pe = pe_ref[rows, :] if has_pe else None
        acc = jnp.dot(x_f.astype(w_dtype), wf_ref[...],
                      preferred_element_type=jnp.float32)
        if has_pe:
            # pe is cast on the VPU here (free) instead of a wrapper-side XLA cast
            # that would cost an extra HBM round trip of pe.
            acc = acc + jnp.dot(x_pe.astype(w_dtype), wpe_ref[...],
                                preferred_element_type=jnp.float32)
        return (acc + bias).astype(o_ref.dtype)

    if g == 1:
        o_ref[...] = rows_out(None)
    else:
        # Lane-dense output: o_ref is the row-major relabelled (rows/g, 128) slab.
        # Lane block j holds tile rows j, j+g, j+2g, ... (a strided row group).
        slab = o_ref.shape[0]
        for j in range(g):
            o_ref[:, j * h:(j + 1) * h] = rows_out(pl.ds(j, slab, stride=g))


# ----------------------------- wrapper ------------------------------------ #

class ConcatNodeEncoderPallas:
    """Deterministically-initialized equivalent of the PyTorch ConcatNodeEncoder."""

    _lane_dense_ok = True  # portability guard for the strided-load packing path

    def __init__(self, feature_dim, dim_hidden, dim_pe, key=None):
        self.feature_dim = feature_dim
        self.dim_hidden = dim_hidden
        self.dim_pe = dim_pe
        in_dim = feature_dim + dim_pe if dim_pe > 0 else feature_dim

        if key is None:
            key = jax.random.PRNGKey(42)
        kw, kb = jax.random.split(key)
        bound = 1.0 / float(jnp.sqrt(jnp.asarray(in_dim, jnp.float32)))
        w = jax.random.uniform(kw, (dim_hidden, in_dim), jnp.float32, -bound, bound)
        b = jax.random.uniform(kb, (dim_hidden,), jnp.float32, -bound, bound)

        wt = w.T  # [in_dim, H]
        if dim_pe > 0:
            self.wf = wt[:feature_dim, :]      # [F, H]
            self.wpe = wt[feature_dim:, :]     # [P, H]
        else:
            self.wf = wt
            self.wpe = None
        self.b = b.reshape(1, dim_hidden)      # 2-D for TPU layout (stays f32)
        self._w_cache = {}                     # dtype -> pre-cast device arrays

    def _weights_for(self, dtype):
        """Per-dtype weight copies cached once (no per-call cast ops in the graph)."""
        dt = jnp.dtype(dtype)
        if dt not in self._w_cache:
            wf = jnp.asarray(self.wf, dt)
            wpe = jnp.asarray(self.wpe, dt) if self.wpe is not None else None
            self._w_cache[dt] = (wf, wpe)
        return self._w_cache[dt]

    # -------------------------------------------------------------------- #

    def _run(self, feature, pe, g, tile_n, vmem_cap, fast_hbm):
        N, F = feature.shape
        P, H = self.dim_pe, self.dim_hidden
        has_pe = P > 0
        dtype = feature.dtype
        itemsize = jnp.dtype(dtype).itemsize

        sub = max(8, 32 // max(1, itemsize))           # sublane multiple for this dtype
        row_mult = sub * g if g > 1 else sub           # also keeps out-slab rows % 8 == 0

        if tile_n is None:
            tile_n = _pick_tile_rows(N, F, P if has_pe else 0, H, g, itemsize,
                                     row_mult, fast_hbm, vmem_cap)
        else:
            tile_n = int(tile_n)
            tile_n = N if tile_n >= N else _round_up(tile_n, row_mult)
        grid = (pl.cdiv(N, tile_n),)

        wf, wpe = self._weights_for(dtype)
        b = self.b

        in_specs = [pl.BlockSpec((tile_n, F), lambda i: (i, 0))]
        args = [feature]
        if has_pe:
            in_specs.append(pl.BlockSpec((tile_n, P), lambda i: (i, 0)))
            args.append(pe)
        # weights/bias: constant block index -> DMA'd once, resident across the grid
        in_specs.append(pl.BlockSpec((F, H), lambda i: (0, 0)))
        args.append(wf)
        if has_pe:
            in_specs.append(pl.BlockSpec((P, H), lambda i: (0, 0)))
            args.append(wpe)
        in_specs.append(pl.BlockSpec((1, H), lambda i: (0, 0)))
        args.append(b)

        if g > 1:
            out_shape = jax.ShapeDtypeStruct((N // g, 128), dtype)
            out_spec = pl.BlockSpec((tile_n // g, 128), lambda i: (i, 0))
        else:
            out_shape = jax.ShapeDtypeStruct((N, H), dtype)
            out_spec = pl.BlockSpec((tile_n, H), lambda i: (i, 0))

        kernel = functools.partial(_node_encoder_kernel, h=H, g=g, has_pe=has_pe)
        out = pl.pallas_call(
            kernel,
            out_shape=out_shape,
            grid=grid,
            in_specs=in_specs,
            out_specs=out_spec,
            compiler_params=pltpu.CompilerParams(
                dimension_semantics=("parallel",),   # v7x: node tiles across both TCs
                vmem_limit_bytes=_vmem_limit_bytes(
                    tile_n, F, P if has_pe else 0, H, g, itemsize, vmem_cap)),
        )(*args)

        if g > 1:
            # TODO(synk): downstream consumers should read the (N*H/128, 128) slab
            # directly; this reshape back to (N, H) is a pure row-major relabel.
            out = out.reshape(N, H)
        return out

    def __call__(self, feature, pe=None, tile_n=None):
        N = feature.shape[0]
        assert feature.shape[1] == self.feature_dim
        H = self.dim_hidden
        if self.dim_pe > 0:
            assert pe is not None and pe.shape == (N, self.dim_pe)

        vmem_cap, fast_hbm = _tpu_limits()

        # Lane-dense output packing eligibility (avoids masked vst / padded writeback
        # when H < 128): relabel (N, H) -> (N*H/128, 128) row-major.
        g = 128 // H if (0 < H < 128 and 128 % H == 0) else 1
        if g > 1 and N % g != 0:
            g = 1
        if g > 1 and not ConcatNodeEncoderPallas._lane_dense_ok:
            g = 1

        if g > 1:
            try:
                return self._run(feature, pe, g, tile_n, vmem_cap, fast_hbm)
            except Exception:  # portability guard: toolchain w/o strided-load lowering
                ConcatNodeEncoderPallas._lane_dense_ok = False
        return self._run(feature, pe, 1, tile_n, vmem_cap, fast_hbm)


# ----------------------------- demo / check -------------------------------- #

if __name__ == "__main__":
    key = jax.random.PRNGKey(0)
    k_feat, k_pe, k_params, k2, k3, k4, k5 = jax.random.split(key, 7)

    F, P, H = 16, 8, 32   # feature_dim, dim_pe, dim_hidden
    enc = ConcatNodeEncoderPallas(F, H, P, key=k_params)
    w_full = jnp.concatenate([enc.wf, enc.wpe], axis=0)          # [F+P, H], f32

    def ref_fn(feat, pe_):
        x = jnp.concatenate([feat.astype(jnp.float32), pe_.astype(jnp.float32)], axis=1)
        return x @ w_full + enc.b

    # 1) small single-tile case (lane-dense eligible: N % (128/H) == 0)
    N = 8
    feature = jax.random.normal(k_feat, (N, F), jnp.float32)
    pe = jax.random.normal(k_pe, (N, P), jnp.float32)
    h = jax.block_until_ready(enc(feature, pe))
    assert h.shape == (N, H)
    assert jnp.allclose(h, ref_fn(feature, pe), atol=1e-5, rtol=1e-5)

    # 2) multi-tile grid with ragged last tile (lane-dense path)
    N2 = 320
    f2 = jax.random.normal(k2, (N2, F), jnp.float32)
    p2 = jax.random.normal(k3, (N2, P), jnp.float32)
    h2 = jax.block_until_ready(enc(f2, p2, tile_n=128))
    assert h2.shape == (N2, H)
    assert jnp.allclose(h2, ref_fn(f2, p2), atol=1e-5, rtol=1e-5)

    # 3) N not divisible by 128/H -> plain (N, H) output layout, ragged last tile
    N3 = 301
    f3 = jax.random.normal(k4, (N3, F), jnp.float32)
    p3 = jax.random.normal(k5, (N3, P), jnp.float32)
    h3 = jax.block_until_ready(enc(f3, p3, tile_n=128))
    assert h3.shape == (N3, H)
    assert jnp.allclose(h3, ref_fn(f3, p3), atol=1e-5, rtol=1e-5)

    # 4) bf16 streaming path (weights follow the input dtype; f32 accumulation in-kernel)
    h2b = jax.block_until_ready(enc(f2.astype(jnp.bfloat16), p2, tile_n=128))
    assert h2b.dtype == jnp.bfloat16
    assert jnp.allclose(h2b.astype(jnp.float32), ref_fn(f2.astype(jnp.bfloat16), p2),
                        atol=0.25, rtol=0.05)

    # 5) dim_pe == 0 path
    enc0 = ConcatNodeEncoderPallas(F, H, 0, key=k_params)
    h0 = jax.block_until_ready(enc0(feature))
    assert h0.shape == (N, H)
    assert jnp.allclose(h0, feature @ enc0.wf + enc0.b, atol=1e-5, rtol=1e-5)

    print("KERNEL_OK")
</pallas_src>

<mosaic_0001>
module attributes {stable_mosaic.version = 11 : i64} {
  func.func @_node_encoder_kernel(%arg0: i32, %arg1: memref<8x16xf32, #tpu.memory_space<vmem>>, %arg2: memref<8x8xf32, #tpu.memory_space<vmem>>, %arg3: memref<16x32xf32, #tpu.memory_space<vmem>>, %arg4: memref<8x32xf32, #tpu.memory_space<vmem>>, %arg5: memref<1x32xf32, #tpu.memory_space<vmem>>, %arg6: memref<2x128xf32, #tpu.memory_space<vmem>>) attributes {dimension_semantics = [#tpu.dimension_semantics<parallel>], iteration_bounds = array<i64: 1>, scalar_prefetch = 0 : i64, scratch_operands = 0 : i64, tpu.core_type = #tpu.core_type<tc>, window_params = [{transform_indices = @transform_0, window_bounds = array<i64: 8, 16>}, {transform_indices = @transform_1, window_bounds = array<i64: 8, 8>}, {pipeline_mode = #tpu.pipeline_mode<synchronous>, transform_indices = @transform_2, window_bounds = array<i64: 16, 32>}, {pipeline_mode = #tpu.pipeline_mode<synchronous>, transform_indices = @transform_3, window_bounds = array<i64: 8, 32>}, {pipeline_mode = #tpu.pipeline_mode<synchronous>, transform_indices = @transform_4, window_bounds = array<i64: 1, 32>}, {transform_indices = @transform_5, window_bounds = array<i64: 2, 128>}]} {
    %c0 = arith.constant 0 : index
    %c0_0 = arith.constant 0 : index
    %0 = vector.load %arg5[%c0, %c0_0] : memref<1x32xf32, #tpu.memory_space<vmem>>, vector<1x32xf32>
    %c0_1 = arith.constant 0 : index
    %c0_2 = arith.constant 0 : index
    %1 = tpu.strided_load %arg1[%c0_1, %c0_2] {strides = array<i32: 4, 1>} : memref<8x16xf32, #tpu.memory_space<vmem>>, vector<2x16xf32>
    %c0_3 = arith.constant 0 : index
    %c0_4 = arith.constant 0 : index
    %2 = tpu.strided_load %arg2[%c0_3, %c0_4] {strides = array<i32: 4, 1>} : memref<8x8xf32, #tpu.memory_space<vmem>>, vector<2x8xf32>
    %c0_5 = arith.constant 0 : index
    %c0_6 = arith.constant 0 : index
    %3 = vector.load %arg3[%c0_5, %c0_6] : memref<16x32xf32, #tpu.memory_space<vmem>>, vector<16x32xf32>
    %cst = arith.constant dense<0.000000e+00> : vector<2x32xf32>
    %4 = tpu.matmul %1, %3, %cst {dimension_numbers = #tpu.dot_dimension_numbers<[1], [0], [0], [1], [0, 0, 1, 1], [], []>} : vector<2x16xf32>, vector<16x32xf32>, vector<2x32xf32> -> vector<2x32xf32>
    %c0_7 = arith.constant 0 : index
    %c0_8 = arith.constant 0 : index
    %5 = vector.load %arg4[%c0_7, %c0_8] : memref<8x32xf32, #tpu.memory_space<vmem>>, vector<8x32xf32>
    %cst_9 = arith.constant dense<0.000000e+00> : vector<2x32xf32>
    %6 = tpu.matmul %2, %5, %cst_9 {dimension_numbers = #tpu.dot_dimension_numbers<[1], [0], [0], [1], [0, 0, 1, 1], [], []>} : vector<2x8xf32>, vector<8x32xf32>, vector<2x32xf32> -> vector<2x32xf32>
    %7 = arith.addf %4, %6 : vector<2x32xf32>
    %8 = vector.broadcast %0 : vector<1x32xf32> to vector<2x32xf32>
    %9 = arith.addf %7, %8 : vector<2x32xf32>
    %c0_10 = arith.constant 0 : index
    %c0_11 = arith.constant 0 : index
    %10 = vector.load %arg6[%c0_10, %c0_11] : memref<2x128xf32, #tpu.memory_space<vmem>>, vector<2x32xf32>
    tpu.vector_store %arg6[%c0_10, %c0_11], %9 {strides = array<i32>} : memref<2x128xf32, #tpu.memory_space<vmem>>, vector<2x32xf32>,
    %c1 = arith.constant 1 : index
    %c0_12 = arith.constant 0 : index
    %11 = tpu.strided_load %arg1[%c1, %c0_12] {strides = array<i32: 4, 1>} : memref<8x16xf32, #tpu.memory_space<vmem>>, vector<2x16xf32>
    %c1_13 = arith.constant 1 : index
    %c0_14 = arith.constant 0 : index
    %12 = tpu.strided_load %arg2[%c1_13, %c0_14] {strides = array<i32: 4, 1>} : memref<8x8xf32, #tpu.memory_space<vmem>>, vector<2x8xf32>
    %c0_15 = arith.constant 0 : index
    %c0_16 = arith.constant 0 : index
    %13 = vector.load %arg3[%c0_15, %c0_16] : memref<16x32xf32, #tpu.memory_space<vmem>>, vector<16x32xf32>
    %cst_17 = arith.constant dense<0.000000e+00> : vector<2x32xf32>
    %14 = tpu.matmul %11, %13, %cst_17 {dimension_numbers = #tpu.dot_dimension_numbers<[1], [0], [0], [1], [0, 0, 1, 1], [], []>} : vector<2x16xf32>, vector<16x32xf32>, vector<2x32xf32> -> vector<2x32xf32>
    %c0_18 = arith.constant 0 : index
    %c0_19 = arith.constant 0 : index
    %15 = vector.load %arg4[%c0_18, %c0_19] : memref<8x32xf32, #tpu.memory_space<vmem>>, vector<8x32xf32>
    %cst_20 = arith.constant dense<0.000000e+00> : vector<2x32xf32>
    %16 = tpu.matmul %12, %15, %cst_20 {dimension_numbers = #tpu.dot_dimension_numbers<[1], [0], [0], [1], [0, 0, 1, 1], [], []>} : vector<2x8xf32>, vector<8x32xf32>, vector<2x32xf32> -> vector<2x32xf32>
    %17 = arith.addf %14, %16 : vector<2x32xf32>
    %18 = vector.broadcast %0 : vector<1x32xf32> to vector<2x32xf32>
    %19 = arith.addf %17, %18 : vector<2x32xf32>
    %c0_21 = arith.constant 0 : index
    %c32 = arith.constant 32 : index
    %20 = vector.load %arg6[%c0_21, %c32] : memref<2x128xf32, #tpu.memory_space<vmem>>, vector<2x32xf32>
    tpu.vector_store %arg6[%c0_21, %c32], %19 {strides = array<i32>} : memref<2x128xf32, #tpu.memory_space<vmem>>, vector<2x32xf32>,
    %c2 = arith.constant 2 : index
    %c0_22 = arith.constant 0 : index
    %21 = tpu.strided_load %arg1[%c2, %c0_22] {strides = array<i32: 4, 1>} : memref<8x16xf32, #tpu.memory_space<vmem>>, vector<2x16xf32>
    %c2_23 = arith.constant 2 : index
    %c0_24 = arith.constant 0 : index
    %22 = tpu.strided_load %arg2[%c2_23, %c0_24] {strides = array<i32: 4, 1>} : memref<8x8xf32, #tpu.memory_space<vmem>>, vector<2x8xf32>
    %c0_25 = arith.constant 0 : index
    %c0_26 = arith.constant 0 : index
    %23 = vector.load %arg3[%c0_25, %c0_26] : memref<16x32xf32, #tpu.memory_space<vmem>>, vector<16x32xf32>
    %cst_27 = arith.constant dense<0.000000e+00> : vector<2x32xf32>
    %24 = tpu.matmul %21, %23, %cst_27 {dimension_numbers = #tpu.dot_dimension_numbers<[1], [0], [0], [1], [0, 0, 1, 1], [], []>} : vector<2x16xf32>, vector<16x32xf32>, vector<2x32xf32> -> vector<2x32xf32>
    %c0_28 = arith.constant 0 : index
    %c0_29 = arith.constant 0 : index
    %25 = vector.load %arg4[%c0_28, %c0_29] : memref<8x32xf32, #tpu.memory_space<vmem>>, vector<8x32xf32>
    %cst_30 = arith.constant dense<0.000000e+00> : vector<2x32xf32>
    %26 = tpu.matmul %22, %25, %cst_30 {dimension_numbers = #tpu.dot_dimension_numbers<[1], [0], [0], [1], [0, 0, 1, 1], [], []>} : vector<2x8xf32>, vector<8x32xf32>, vector<2x32xf32> -> vector<2x32xf32>
    %27 = arith.addf %24, %26 : vector<2x32xf32>
    %28 = vector.broadcast %0 : vector<1x32xf32> to vector<2x32xf32>
    %29 = arith.addf %27, %28 : vector<2x32xf32>
    %c0_31 = arith.constant 0 : index
    %c64 = arith.constant 64 : index
    %30 = vector.load %arg6[%c0_31, %c64] : memref<2x128xf32, #tpu.memory_space<vmem>>, vector<2x32xf32>
    tpu.vector_store %arg6[%c0_31, %c64], %29 {strides = array<i32>} : memref<2x128xf32, #tpu.memory_space<vmem>>, vector<2x32xf32>,
    %c3 = arith.constant 3 : index
    %c0_32 = arith.constant 0 : index
    %31 = tpu.strided_load %arg1[%c3, %c0_32] {strides = array<i32: 4, 1>} : memref<8x16xf32, #tpu.memory_space<vmem>>, vector<2x16xf32>
    %c3_33 = arith.constant 3 : index
    %c0_34 = arith.constant 0 : index
    %32 = tpu.strided_load %arg2[%c3_33, %c0_34] {strides = array<i32: 4, 1>} : memref<8x8xf32, #tpu.memory_space<vmem>>, vector<2x8xf32>
    %c0_35 = arith.constant 0 : index
    %c0_36 = arith.constant 0 : index
    %33 = vector.load %arg3[%c0_35, %c0_36] : memref<16x32xf32, #tpu.memory_space<vmem>>, vector<16x32xf32>
    %cst_37 = arith.constant dense<0.000000e+00> : vector<2x32xf32>
    %34 = tpu.matmul %31, %33, %cst_37 {dimension_numbers = #tpu.dot_dimension_numbers<[1], [0], [0], [1], [0, 0, 1, 1], [], []>} : vector<2x16xf32>, vector<16x32xf32>, vector<2x32xf32> -> vector<2x32xf32>
    %c0_38 = arith.constant 0 : index
    %c0_39 = arith.constant 0 : index
    %35 = vector.load %arg4[%c0_38, %c0_39] : memref<8x32xf32, #tpu.memory_space<vmem>>, vector<8x32xf32>
    %cst_40 = arith.constant dense<0.000000e+00> : vector<2x32xf32>
    %36 = tpu.matmul %32, %35, %cst_40 {dimension_numbers = #tpu.dot_dimension_numbers<[1], [0], [0], [1], [0, 0, 1, 1], [], []>} : vector<2x8xf32>, vector<8x32xf32>, vector<2x32xf32> -> vector<2x32xf32>
    %37 = arith.addf %34, %36 : vector<2x32xf32>
    %38 = vector.broadcast %0 : vector<1x32xf32> to vector<2x32xf32>
    %39 = arith.addf %37, %38 : vector<2x32xf32>
    %c0_41 = arith.constant 0 : index
    %c96 = arith.constant 96 : index
    %40 = vector.load %arg6[%c0_41, %c96] : memref<2x128xf32, #tpu.memory_space<vmem>>, vector<2x32xf32>
    tpu.vector_store %arg6[%c0_41, %c96], %39 {strides = array<i32>} : memref<2x128xf32, #tpu.memory_space<vmem>>, vector<2x32xf32>,
    return
  }
  func.func @transform_0(%arg0: i32) -> (i32, i32) {
    %c0_i32 = arith.constant 0 : i32
    %c0_i32_0 = arith.constant 0 : i32
    return %arg0, %c0_i32 : i32, i32
  }
  func.func @transform_1(%arg0: i32) -> (i32, i32) {
    %c0_i32 = arith.constant 0 : i32
    %c0_i32_0 = arith.constant 0 : i32
    return %arg0, %c0_i32 : i32, i32
  }
  func.func @transform_2(%arg0: i32) -> (i32, i32) {
    %c0_i32 = arith.constant 0 : i32
    %c0_i32_0 = arith.constant 0 : i32
    %c0_i32_1 = arith.constant 0 : i32
    return %c0_i32, %c0_i32_0 : i32, i32
  }
  func.func @transform_3(%arg0: i32) -> (i32, i32) {
    %c0_i32 = arith.constant 0 : i32
    %c0_i32_0 = arith.constant 0 : i32
    %c0_i32_1 = arith.constant 0 : i32
    return %c0_i32, %c0_i32_0 : i32, i32
  }
  func.func @transform_4(%arg0: i32) -> (i32, i32) {
    %c0_i32 = arith.constant 0 : i32
    %c0_i32_0 = arith.constant 0 : i32
    %c0_i32_1 = arith.constant 0 : i32
    return %c0_i32, %c0_i32_0 : i32, i32
  }
  func.func @transform_5(%arg0: i32) -> (i32, i32) {
    %c0_i32 = arith.constant 0 : i32
    %c0_i32_0 = arith.constant 0 : i32
    return %arg0, %c0_i32 : i32, i32
  }
}

module attributes {stable_mosaic.version = 11 : i64} {
  func.func @_node_encoder_kernel(%arg0: i32, %arg1: memref<8x16xf32, #tpu.memory_space<vmem>>, %arg2: memref<8x8xf32, #tpu.memory_space<vmem>>, %arg3: memref<16x32xf32, #tpu.memory_space<vmem>>, %arg4: memref<8x32xf32, #tpu.memory_space<vmem>>, %arg5: memref<1x32xf32, #tpu.memory_space<vmem>>, %arg6: memref<8x32xf32, #tpu.memory_space<vmem>>) attributes {dimension_semantics = [#tpu.dimension_semantics<parallel>], iteration_bounds = array<i64: 1>, scalar_prefetch = 0 : i64, scratch_operands = 0 : i64, tpu.core_type = #tpu.core_type<tc>, window_params = [{transform_indices = @transform_0, window_bounds = array<i64: 8, 16>}, {transform_indices = @transform_1, window_bounds = array<i64: 8, 8>}, {pipeline_mode = #tpu.pipeline_mode<synchronous>, transform_indices = @transform_2, window_bounds = array<i64: 16, 32>}, {pipeline_mode = #tpu.pipeline_mode<synchronous>, transform_indices = @transform_3, window_bounds = array<i64: 8, 32>}, {pipeline_mode = #tpu.pipeline_mode<synchronous>, transform_indices = @transform_4, window_bounds = array<i64: 1, 32>}, {transform_indices = @transform_5, window_bounds = array<i64: 8, 32>}]} {
    %c0 = arith.constant 0 : index
    %c0_0 = arith.constant 0 : index
    %0 = vector.load %arg5[%c0, %c0_0] : memref<1x32xf32, #tpu.memory_space<vmem>>, vector<1x32xf32>
    %c0_1 = arith.constant 0 : index
    %c0_2 = arith.constant 0 : index
    %1 = vector.load %arg1[%c0_1, %c0_2] : memref<8x16xf32, #tpu.memory_space<vmem>>, vector<8x16xf32>
    %c0_3 = arith.constant 0 : index
    %c0_4 = arith.constant 0 : index
    %2 = vector.load %arg2[%c0_3, %c0_4] : memref<8x8xf32, #tpu.memory_space<vmem>>, vector<8x8xf32>
    %c0_5 = arith.constant 0 : index
    %c0_6 = arith.constant 0 : index
    %3 = vector.load %arg3[%c0_5, %c0_6] : memref<16x32xf32, #tpu.memory_space<vmem>>, vector<16x32xf32>
    %cst = arith.constant dense<0.000000e+00> : vector<8x32xf32>
    %4 = tpu.matmul %1, %3, %cst {dimension_numbers = #tpu.dot_dimension_numbers<[1], [0], [0], [1], [0, 0, 1, 1], [], []>} : vector<8x16xf32>, vector<16x32xf32>, vector<8x32xf32> -> vector<8x32xf32>
    %c0_7 = arith.constant 0 : index
    %c0_8 = arith.constant 0 : index
    %5 = vector.load %arg4[%c0_7, %c0_8] : memref<8x32xf32, #tpu.memory_space<vmem>>, vector<8x32xf32>
    %cst_9 = arith.constant dense<0.000000e+00> : vector<8x32xf32>
    %6 = tpu.matmul %2, %5, %cst_9 {dimension_numbers = #tpu.dot_dimension_numbers<[1], [0], [0], [1], [0, 0, 1, 1], [], []>} : vector<8x8xf32>, vector<8x32xf32>, vector<8x32xf32> -> vector<8x32xf32>
    %7 = arith.addf %4, %6 : vector<8x32xf32>
    %8 = vector.broadcast %0 : vector<1x32xf32> to vector<8x32xf32>
    %9 = arith.addf %7, %8 : vector<8x32xf32>
    %c0_10 = arith.constant 0 : index
    %c0_11 = arith.constant 0 : index
    %10 = vector.load %arg6[%c0_10, %c0_11] : memref<8x32xf32, #tpu.memory_space<vmem>>, vector<8x32xf32>
    tpu.vector_store %arg6[%c0_10, %c0_11], %9 {strides = array<i32>} : memref<8x32xf32, #tpu.memory_space<vmem>>, vector<8x32xf32>,
    return
  }
  func.func @transform_0(%arg0: i32) -> (i32, i32) {
    %c0_i32 = arith.constant 0 : i32
    %c0_i32_0 = arith.constant 0 : i32
    return %arg0, %c0_i32 : i32, i32
  }
  func.func @transform_1(%arg0: i32) -> (i32, i32) {
    %c0_i32 = arith.constant 0 : i32
    %c0_i32_0 = arith.constant 0 : i32
    return %arg0, %c0_i32 : i32, i32
  }
  func.func @transform_2(%arg0: i32) -> (i32, i32) {
    %c0_i32 = arith.constant 0 : i32
    %c0_i32_0 = arith.constant 0 : i32
    %c0_i32_1 = arith.constant 0 : i32
    return %c0_i32, %c0_i32_0 : i32, i32
  }
  func.func @transform_3(%arg0: i32) -> (i32, i32) {
    %c0_i32 = arith.constant 0 : i32
    %c0_i32_0 = arith.constant 0 : i32
    %c0_i32_1 = arith.constant 0 : i32
    return %c0_i32, %c0_i32_0 : i32, i32
  }
  func.func @transform_4(%arg0: i32) -> (i32, i32) {
    %c0_i32 = arith.constant 0 : i32
    %c0_i32_0 = arith.constant 0 : i32
    %c0_i32_1 = arith.constant 0 : i32
    return %c0_i32, %c0_i32_0 : i32, i32
  }
  func.func @transform_5(%arg0: i32) -> (i32, i32) {
    %c0_i32 = arith.constant 0 : i32
    %c0_i32_0 = arith.constant 0 : i32
    return %arg0, %c0_i32 : i32, i32
  }
}

</mosaic_0001>

<bundles_post_ra>
// kernel: tpu_custom_call.1
= control target key start
LH: loop header
LB: loop body
LE: loop exit
PB: predicated region body
PF: predicated region fallthrough
CT: control target
= control target key end

     0   :  { %10 = vsyncpa [#allocation3], 0  ;;  %s1024_s0 = inlined_call_operand.hbm [shape: f32[8,16], index: 0, kind: input, shape index: {}]   ;;  %s1025_s1 = inlined_call_operand.hbm [shape: f32[8,8], index: 1, kind: input, shape index: {}]   ;;  %s1026_s2 = inlined_call_operand.hbm [shape: f32[16,32], index: 2, kind: input, shape index: {}]   ;;  %s1027_s3 = inlined_call_operand.vmem [shape: f32[8,32], index: 3, kind: input, shape index: {}]   ;;  %s1028_s4 = inlined_call_operand.vmem [shape: f32[1,32], index: 4, kind: input, shape index: {}]   ;;  %s1029_s5 = inlined_call_operand.hbm [shape: f32[2,128], index: 5, kind: output, shape index: {}]  }
   0x1   :  { %11 = vsyncpa [#allocation6], 0 }
   0x2   :  { %12 = vsyncpa [#allocation4], 0  ;;  %s912_s18 = smov [#allocation5]   ;;  %s913_s20 = smov [#allocation2]  }
   0x3   :  { %s29_s19 = sshll.u32 %s912_s18, 4  ;;  %s19_s21 = sshll.u32 %s913_s20, 4  ;;  %s30_s19 = int_to_ptr.vmem [resolvable:$true] %s29_s19  ;;  %s20_s21 = int_to_ptr.vmem [resolvable:$true] %s19_s21 }
   0x4   :  { %s818_s24 = scalar_lea.hbm %s1025_s1, 128 }
   0x5   :  { %p819_p0 = scmp.ne.s32.totalorder %s1025_s1, %s818_s24  ;;  %p822_p1 = scmp.lt.u32.totalorder %s818_s24, %s1025_s1 }
   0x7   :  { %p824_p2 = pnand %p822_p1, %p819_p0 }
   0x9   :  { %827 = shalt.err (!%p824_p2)
}
   0xa   :  { %s828_s29 = scalar_lea.vmem %s30_s19, 128  ;;  %p833_p4 = scmp.lt.s32.totalorder %s30_s19, %s30_s19 }
   0xb   :  { %p829_p3 = scmp.ne.s32.totalorder %s30_s19, %s828_s29  ;;  %p834_p5 = scmp.lt.s32.totalorder %s828_s29, %s828_s29 }
   0xd   :  { %p835_p6 = por %p834_p5, %p833_p4 }
   0xf   :  { %p836_p7 = pnand %p835_p6, %p829_p3 }
  0x11   :  { %839 = shalt.err (!%p836_p7)
}
  0x12   :  { %32 = dma.hbm_to_vmem [thread:$0]  %s1025_s1, 128, %s30_s19, [#allocation6]  }
  0x13   :  { %s840_s9 = scalar_lea.hbm %s1024_s0, 128 }
  0x14   :  { %p841_p8 = scmp.ne.s32.totalorder %s1024_s0, %s840_s9  ;;  %p844_p9 = scmp.lt.u32.totalorder %s840_s9, %s1024_s0 }
  0x16   :  { %p846_p10 = pnand %p844_p9, %p841_p8 }
  0x18   :  { %849 = shalt.err (!%p846_p10)
}
  0x19   :  { %s850_s14 = scalar_lea.vmem %s20_s21, 128  ;;  %p855_p12 = scmp.lt.s32.totalorder %s20_s21, %s20_s21 }
  0x1a   :  { %p851_p11 = scmp.ne.s32.totalorder %s20_s21, %s850_s14  ;;  %p856_p13 = scmp.lt.s32.totalorder %s850_s14, %s850_s14 }
  0x1c   :  { %p857_p0 = por %p856_p13, %p855_p12 }
  0x1e   :  { %p858_p1 = pnand %p857_p0, %p851_p11 }
  0x20   :  { %861 = shalt.err (!%p858_p1)
}
  0x21   :  { %22 = dma.hbm_to_vmem [thread:$0]  %s1024_s0, 128, %s20_s21, [#allocation3]  }
  0x22   :  { %s914_s16 = smov [#allocation7]   ;;  %s862_s20 = scalar_lea.hbm %s1026_s2, 256 }
  0x23   :  { %s38_s17 = sshll.u32 %s914_s16, 4  ;;  %p863_p2 = scmp.ne.s32.totalorder %s1026_s2, %s862_s20  ;;  %s39_s17 = int_to_ptr.vmem [resolvable:$true] %s38_s17 }
  0x24   :  { %p866_p3 = scmp.lt.u32.totalorder %s862_s20, %s1026_s2 }
  0x26   :  { %p868_p4 = pnand %p866_p3, %p863_p2 }
  0x28   :  { %871 = shalt.err (!%p868_p4)
}
  0x29   :  { %s872_s26 = scalar_lea.vmem %s39_s17, 256  ;;  %p877_p6 = scmp.lt.s32.totalorder %s39_s17, %s39_s17 }
  0x2a   :  { %p873_p5 = scmp.ne.s32.totalorder %s39_s17, %s872_s26  ;;  %p878_p7 = scmp.lt.s32.totalorder %s872_s26, %s872_s26 }
  0x2c   :  { %p879_p8 = por %p878_p7, %p877_p6 }
  0x2e   :  { %p880_p9 = pnand %p879_p8, %p873_p5 }
  0x30   :  { %883 = shalt.err (!%p880_p9)
}
  0x31   :  { %s915_s0 = smov 128   ;;  %s916_s21 = smov 8  }
  0x32   :  { %44 = dma.hbm_to_vmem [thread:$0]  %s1026_s2, 256, %s39_s17, [#allocation6], %s915_s0, %s915_s0, %s916_s21  }
  0x33   :  { %906 = dma.done.wait [#allocation3], 128  }
  0x34   :  { %907 = vsyncadd [#allocation3], 4294967168 }
  0x35   :  { %908 = dma.done.wait [#allocation6], 384  }
  0x36   :  { %909 = vsyncadd [#allocation6], 4294966912  ;;  %v917_v0 = vmov 0.0|0.0   ;;  %v918_v1 = vmov 0.0   ;;  %vm919_vm0 = vmmov 0   ;;  %vm64_vm1 = vcmask 64512  }
  0x37   :  { %794 = vmatprep.subr.bf16.mxu1 %v917_v0  ;;  %746 = vmatprep.subr.mxu0 %v918_v1  ;;  %v61_v2 = vld [vmem:[#allocation7] sm:$0xff]  ;;  %v62_v3 = vld [vmem:[#allocation7 + $0x8] sm:$0xff]  ;;  %v63_v4 = vld [vmem:[%s1027_s3] sm:$0xff]  ;;  %vm138_vm2 = vcmask 130048   ;;  %vm219_vm3 = vcmask 254976   ;;  %s920_s6 = smov 32  }
  0x38   :  { %748 = vmatprep.mubr.msk.f32.mxu0 %vm919_vm0, %v918_v1  ;;  %755 = vmatprep.mubr.msk.f32.mxu1 %vm919_vm0, %v918_v1  ;;  %v795_v5 = vpack.c.bf16 %v62_v3, %v61_v2  ;;  %v60_v6 = vld [vmem:[#allocation5] ss:$4 sm:$0x3]  ;;  %v59_v7 = vld [vmem:[#allocation2] ss:$4 sm:$0x3] }
  0x39   :  { %747 = vmatpush3.msra.mxu0 %v63_v4  ;;  %v224_v8 = vld [vmem:[#allocation5 + $0x1] ss:$4 sm:$0x3]  ;;  %v222_v9 = vld [vmem:[#allocation2 + $0x1] ss:$4 sm:$0x3] }
  0x3a   :  { %749 = vmatmul.mubr.msk.f32.vlgmr.msra.gmra.mrb[0].mxu0 %vm64_vm1, %v60_v6  ;;  %758 = vmatprep.subr.mxu0 %v918_v1  ;;  %v384_v10 = vld [vmem:[#allocation5 + $0x2] ss:$4 sm:$0x3]  ;;  %v382_v11 = vld [vmem:[#allocation2 + $0x2] ss:$4 sm:$0x3] }
  0x3b   :  { %796 = vmatpush3.bf16.msra.mxu1 %v795_v5  ;;  %759 = vmatpush3.msra.mxu0 %v63_v4  ;;  %v544_v12 = vld [vmem:[#allocation5 + $0x3] ss:$4 sm:$0x3]  ;;  %v542_v13 = vld [vmem:[#allocation2 + $0x3] ss:$4 sm:$0x3] }
  0x3c   :  { %797 = vmatprep.subr.bf16.mxu1 %v917_v0  ;;  %760 = vmatprep.mubr.msk.f32.mxu0 %vm919_vm0, %v918_v1  ;;  %v719_v16 = vld [vmem:[%s1028_s4] ss:$0 sm:$0xff]  ;;  %s921_s4 = smov 64   ;;  %s922_s7 = smov 96   ;;  %vm379_vm4 = vcmask 517376   ;;  %vm539_vm5 = vcmask 779776  }
  0x3d   :  { %770 = vmatprep.subr.mxu0 %v918_v1  ;;  %s923_s8 = smov [#allocation8]   ;;  %vm699_vm6 = vcmask 1042176  }
  0x3e   :  { %756 = vmatmul.mubr.msk.f32.vlgmr.msra.gmra.mrb[0].mxu1 %vm138_vm2, %v59_v7  ;;  %761 = vmatmul.mubr.msk.f32.vlgmr.msra.gmra.mrb[2].mxu0 %vm64_vm1, %v224_v8  ;;  %s707_s9 = sshll.u32 %s923_s8, 4  ;;  %s708_s9 = int_to_ptr.vmem [resolvable:$true] %s707_s9 }
  0x3f   :  { %799 = vmatpush3.bf16.msra.mxu1 %v795_v5  ;;  %767 = vmatprep.mubr.msk.f32.mxu1 %vm919_vm0, %v918_v1  ;;  %s884_s10 = scalar_lea.vmem %s708_s9, 32  ;;  %p889_p11 = scmp.lt.s32.totalorder %s708_s9, %s708_s9 }
  0x40   :  { %800 = vmatprep.subr.bf16.mxu1 %v917_v0  ;;  %771 = vmatpush3.msra.mxu0 %v63_v4  ;;  %p885_p10 = scmp.ne.s32.totalorder %s708_s9, %s884_s10  ;;  %p890_p12 = scmp.lt.s32.totalorder %s884_s10, %s884_s10 }
  0x41   :  { %772 = vmatprep.mubr.msk.f32.mxu0 %vm919_vm0, %v918_v1  ;;  %782 = vmatprep.subr.mxu0 %v918_v1 }
  0x42   :  { %768 = vmatmul.mubr.msk.f32.vlgmr.msra.gmra.mrb[2].mxu1 %vm138_vm2, %v222_v9  ;;  %773 = vmatmul.mubr.msk.f32.vlgmr.msra.gmra.mrb[4].mxu0 %vm64_vm1, %v384_v10  ;;  %p891_p13 = por %p890_p12, %p889_p11 }
  0x43   :  { %802 = vmatpush3.bf16.msra.mxu1 %v795_v5  ;;  %779 = vmatprep.mubr.msk.f32.mxu1 %vm919_vm0, %v918_v1 }
  0x44   :  { %803 = vmatprep.subr.bf16.mxu1 %v917_v0  ;;  %783 = vmatpush3.msra.mxu0 %v63_v4  ;;  %p892_p0 = pnand %p891_p13, %p885_p10 }
  0x45   :  { %784 = vmatprep.mubr.msk.f32.mxu0 %vm919_vm0, %v918_v1 }
  0x46   :  { %780 = vmatmul.mubr.msk.f32.vlgmr.msra.gmra.mrb[4].mxu1 %vm138_vm2, %v382_v11  ;;  %785 = vmatmul.mubr.msk.f32.vlgmr.msra.gmra.mrb[6].mxu0 %vm64_vm1, %v544_v12 }
  0x47   :  { %805 = vmatpush3.bf16.msra.mxu1 %v795_v5  ;;  %791 = vmatprep.mubr.msk.f32.mxu1 %vm919_vm0, %v918_v1 }
  0x4a   :  { %792 = vmatmul.mubr.msk.f32.vlgmr.msra.gmra.mrb[6].mxu1 %vm138_vm2, %v542_v13 }
 0x10d   :  { %v134_v14 = vpop.f32.mrb[0].mxu0 }
 0x10e   :  { %v750_v15 = vpop.f32.mrb[1].mxu0 }
 0x111   :  { %v208_v17 = vpop.f32.mrb[0].mxu1  ;;  %v297_v18 = vpop.f32.mrb[2].mxu0 }
 0x112   :  { %v209_v19 = vadd.f32 %v208_v17, %v134_v14  ;;  %v757_v20 = vpop.f32.mrb[1].mxu1  ;;  %v762_v21 = vpop.f32.mrb[3].mxu0 }
 0x114   :  { %v218_v22 = vadd.f32 %v719_v16, %v209_v19 }
 0x115   :  { %v370_v23 = vpop.f32.mrb[2].mxu1  ;;  %v457_v24 = vpop.f32.mrb[4].mxu0 }
 0x116   :  { %220 = vst.msk [vmem:[#allocation8] sm:$0x3] %vm219_vm3, %v218_v22  ;;  %v371_v25 = vadd.f32 %v370_v23, %v297_v18  ;;  %v769_v26 = vpop.f32.mrb[3].mxu1  ;;  %v774_v27 = vpop.f32.mrb[5].mxu0 }
 0x118   :  { %v374_v28 = vadd.f32 %v719_v16, %v371_v25 }
 0x119   :  { %v530_v29 = vpop.f32.mrb[4].mxu1  ;;  %v617_v30 = vpop.f32.mrb[6].mxu0 }
 0x11a   :  { %v531_v31 = vadd.f32 %v530_v29, %v457_v24  ;;  %v781_v32 = vpop.f32.mrb[5].mxu1  ;;  %376 = vrot.lane.b32.xlu0 %v374_v28, %s920_s6  ;;  %v786_v33 = vpop.f32.mrb[7].mxu0 }
 0x11c   :  { %v534_v34 = vadd.f32 %v719_v16, %v531_v31 }
 0x11d   :  { %v690_v35 = vpop.f32.mrb[6].mxu1 }
 0x11e   :  { %v691_v36 = vadd.f32 %v690_v35, %v617_v30  ;;  %v793_v37 = vpop.f32.mrb[7].mxu1  ;;  %536 = vrot.lane.b32.xlu0 %v534_v34, %s921_s4 }
 0x120   :  { %v694_v38 = vadd.f32 %v719_v16, %v691_v36 }
 0x122   :  { %696 = vrot.lane.b32.xlu1 %v694_v38, %s922_s7 }
 0x18c   :  { %v377_v39 = vpop.permute.xlu0 %376 }
 0x18d   :  { %380 = vst.msk [vmem:[#allocation8] sm:$0x3] %vm379_vm4, %v377_v39 }
 0x190   :  { %v537_v40 = vpop.permute.xlu0 %536 }
 0x191   :  { %540 = vst.msk [vmem:[#allocation8] sm:$0x3] %vm539_vm5, %v537_v40 }
 0x194   :  { %v697_v41 = vpop.permute.xlu1 %696 }
 0x195   :  { %700 = vst.msk [vmem:[#allocation8] sm:$0x3] %vm699_vm6, %v697_v41 }
 0x196   :  { %895 = shalt.err (!%p892_p0)
}
 0x197   :  { %s896_s13 = scalar_lea.hbm %s1029_s5, 32 }
 0x198   :  { %p897_p1 = scmp.ne.s32.totalorder %s1029_s5, %s896_s13  ;;  %p900_p2 = scmp.lt.u32.totalorder %s896_s13, %s1029_s5 }
 0x19a   :  { %p902_p3 = pnand %p900_p2, %p897_p1 }
 0x19c   :  { %905 = shalt.err (!%p902_p3)
}
 0x19d   :  { %710 = dma.vmem_to_hbm [thread:$0]  %s708_s9, 32, %s1029_s5, [#allocation4]  }
 0x19e   :  { %910 = dma.done.wait [#allocation4], 32  }
 0x19f   :  { %911 = vsyncadd [#allocation4], 4294967264 }
 0x1a0   :  { %714 = vsyncpa [#allocation3], 1 }
 0x1a1   :  { %715 = vsyncpa [#allocation6], 1 }
 0x1a2   :  { %716 = vsyncpa [#allocation4], 1 }

// kernel: tpu_custom_call.1
= control target key start
LH: loop header
LB: loop body
LE: loop exit
PB: predicated region body
PF: predicated region fallthrough
CT: control target
= control target key end

     0   :  { %10 = vsyncpa [#allocation3], 0  ;;  %s456_s0 = inlined_call_operand.hbm [shape: f32[8,16], index: 0, kind: input, shape index: {}]   ;;  %s457_s1 = inlined_call_operand.hbm [shape: f32[8,8], index: 1, kind: input, shape index: {}]   ;;  %s458_s2 = inlined_call_operand.hbm [shape: f32[16,32], index: 2, kind: input, shape index: {}]   ;;  %s459_s3 = inlined_call_operand.vmem [shape: f32[8,32], index: 3, kind: input, shape index: {}]   ;;  %s460_s4 = inlined_call_operand.vmem [shape: f32[1,32], index: 4, kind: input, shape index: {}]   ;;  %s461_s5 = inlined_call_operand.hbm [shape: f32[8,32], index: 5, kind: output, shape index: {}]  }
   0x1   :  { %11 = vsyncpa [#allocation6], 0 }
   0x2   :  { %12 = vsyncpa [#allocation4], 0  ;;  %s363_s18 = smov [#allocation5]   ;;  %s364_s20 = smov [#allocation2]  }
   0x3   :  { %s29_s19 = sshll.u32 %s363_s18, 4  ;;  %s19_s21 = sshll.u32 %s364_s20, 4  ;;  %s30_s19 = int_to_ptr.vmem [resolvable:$true] %s29_s19  ;;  %s20_s21 = int_to_ptr.vmem [resolvable:$true] %s19_s21 }
   0x4   :  { %s269_s24 = scalar_lea.hbm %s457_s1, 128 }
   0x5   :  { %p270_p0 = scmp.ne.s32.totalorder %s457_s1, %s269_s24  ;;  %p273_p1 = scmp.lt.u32.totalorder %s269_s24, %s457_s1 }
   0x7   :  { %p275_p2 = pnand %p273_p1, %p270_p0 }
   0x9   :  { %278 = shalt.err (!%p275_p2)
}
   0xa   :  { %s279_s29 = scalar_lea.vmem %s30_s19, 128  ;;  %p284_p4 = scmp.lt.s32.totalorder %s30_s19, %s30_s19 }
   0xb   :  { %p280_p3 = scmp.ne.s32.totalorder %s30_s19, %s279_s29  ;;  %p285_p5 = scmp.lt.s32.totalorder %s279_s29, %s279_s29 }
   0xd   :  { %p286_p6 = por %p285_p5, %p284_p4 }
   0xf   :  { %p287_p7 = pnand %p286_p6, %p280_p3 }
  0x11   :  { %290 = shalt.err (!%p287_p7)
}
  0x12   :  { %32 = dma.hbm_to_vmem [thread:$0]  %s457_s1, 128, %s30_s19, [#allocation6]  }
  0x13   :  { %s291_s9 = scalar_lea.hbm %s456_s0, 128 }
  0x14   :  { %p292_p8 = scmp.ne.s32.totalorder %s456_s0, %s291_s9  ;;  %p295_p9 = scmp.lt.u32.totalorder %s291_s9, %s456_s0 }
  0x16   :  { %p297_p10 = pnand %p295_p9, %p292_p8 }
  0x18   :  { %300 = shalt.err (!%p297_p10)
}
  0x19   :  { %s301_s14 = scalar_lea.vmem %s20_s21, 128  ;;  %p306_p12 = scmp.lt.s32.totalorder %s20_s21, %s20_s21 }
  0x1a   :  { %p302_p11 = scmp.ne.s32.totalorder %s20_s21, %s301_s14  ;;  %p307_p13 = scmp.lt.s32.totalorder %s301_s14, %s301_s14 }
  0x1c   :  { %p308_p0 = por %p307_p13, %p306_p12 }
  0x1e   :  { %p309_p1 = pnand %p308_p0, %p302_p11 }
  0x20   :  { %312 = shalt.err (!%p309_p1)
}
  0x21   :  { %22 = dma.hbm_to_vmem [thread:$0]  %s456_s0, 128, %s20_s21, [#allocation3]  }
  0x22   :  { %s365_s16 = smov [#allocation7]   ;;  %s313_s20 = scalar_lea.hbm %s458_s2, 256 }
  0x23   :  { %s38_s17 = sshll.u32 %s365_s16, 4  ;;  %p314_p2 = scmp.ne.s32.totalorder %s458_s2, %s313_s20  ;;  %s39_s17 = int_to_ptr.vmem [resolvable:$true] %s38_s17 }
  0x24   :  { %p317_p3 = scmp.lt.u32.totalorder %s313_s20, %s458_s2 }
  0x26   :  { %p319_p4 = pnand %p317_p3, %p314_p2 }
  0x28   :  { %322 = shalt.err (!%p319_p4)
}
  0x29   :  { %s323_s26 = scalar_lea.vmem %s39_s17, 256  ;;  %p328_p6 = scmp.lt.s32.totalorder %s39_s17, %s39_s17 }
  0x2a   :  { %p324_p5 = scmp.ne.s32.totalorder %s39_s17, %s323_s26  ;;  %p329_p7 = scmp.lt.s32.totalorder %s323_s26, %s323_s26 }
  0x2c   :  { %p330_p8 = por %p329_p7, %p328_p6 }
  0x2e   :  { %p331_p9 = pnand %p330_p8, %p324_p5 }
  0x30   :  { %334 = shalt.err (!%p331_p9)
}
  0x31   :  { %s366_s0 = smov 128   ;;  %s367_s21 = smov 8  }
  0x32   :  { %44 = dma.hbm_to_vmem [thread:$0]  %s458_s2, 256, %s39_s17, [#allocation6], %s366_s0, %s366_s0, %s367_s21  }
  0x33   :  { %357 = dma.done.wait [#allocation3], 128  }
  0x34   :  { %358 = vsyncadd [#allocation3], 4294967168 }
  0x35   :  { %359 = dma.done.wait [#allocation6], 384  }
  0x36   :  { %360 = vsyncadd [#allocation6], 4294966912  ;;  %v368_v0 = vmov 0.0|0.0   ;;  %v369_v1 = vmov 0.0   ;;  %vm370_vm0 = vmmov 0   ;;  %vm64_vm1 = vcmask 64512  }
  0x37   :  { %257 = vmatprep.subr.bf16.mxu1 %v368_v0  ;;  %245 = vmatprep.subr.mxu0 %v369_v1  ;;  %v61_v2 = vld [vmem:[#allocation7] sm:$0xff]  ;;  %v62_v3 = vld [vmem:[#allocation7 + $0x8] sm:$0xff]  ;;  %v63_v4 = vld [vmem:[%s459_s3] sm:$0xff]  ;;  %vm138_vm2 = vcmask 130048   ;;  %s371_s7 = smov [#allocation8]   ;;  %vm219_vm3 = vcmask 261120  }
  0x38   :  { %247 = vmatprep.mubr.msk.f32.mxu0 %vm370_vm0, %v369_v1  ;;  %254 = vmatprep.mubr.msk.f32.mxu1 %vm370_vm0, %v369_v1  ;;  %v258_v5 = vpack.c.bf16 %v62_v3, %v61_v2  ;;  %v60_v6 = vld [vmem:[#allocation5] sm:$0xff]  ;;  %v59_v7 = vld [vmem:[#allocation2] sm:$0xff]  ;;  %s227_s8 = sshll.u32 %s371_s7, 4  ;;  %s228_s8 = int_to_ptr.vmem [resolvable:$true] %s227_s8 }
  0x39   :  { %246 = vmatpush3.msra.mxu0 %v63_v4  ;;  %v239_v10 = vld [vmem:[%s460_s4] ss:$0 sm:$0xff]  ;;  %s335_s3 = scalar_lea.vmem %s228_s8, 128  ;;  %p340_p11 = scmp.lt.s32.totalorder %s228_s8, %s228_s8 }
  0x3a   :  { %248 = vmatmul.mubr.msk.f32.vlgmr.msra.gmra.mrb[0].mxu0 %vm64_vm1, %v60_v6  ;;  %259 = vmatpush3.bf16.msra.mxu1 %v258_v5  ;;  %p336_p10 = scmp.ne.s32.totalorder %s228_s8, %s335_s3  ;;  %p341_p12 = scmp.lt.s32.totalorder %s335_s3, %s335_s3 }
  0x3c   :  { %p342_p13 = por %p341_p12, %p340_p11 }
  0x3d   :  { %255 = vmatmul.mubr.msk.f32.vlgmr.msra.gmra.mrb[0].mxu1 %vm138_vm2, %v59_v7 }
  0x3e   :  { %p343_p0 = pnand %p342_p13, %p336_p10 }
 0x10d   :  { %v134_v8 = vpop.f32.mrb[0].mxu0 }
 0x10e   :  { %v249_v9 = vpop.f32.mrb[1].mxu0 }
 0x110   :  { %v208_v11 = vpop.f32.mrb[0].mxu1 }
 0x111   :  { %v209_v12 = vadd.f32 %v208_v11, %v134_v8  ;;  %v256_v13 = vpop.f32.mrb[1].mxu1 }
 0x113   :  { %v218_v14 = vadd.f32 %v239_v10, %v209_v12 }
 0x115   :  { %220 = vst.msk [vmem:[#allocation8] sm:$0xff] %vm219_vm3, %v218_v14 }
 0x116   :  { %346 = shalt.err (!%p343_p0)
}
 0x117   :  { %s347_s4 = scalar_lea.hbm %s461_s5, 128 }
 0x118   :  { %p348_p1 = scmp.ne.s32.totalorder %s461_s5, %s347_s4  ;;  %p351_p2 = scmp.lt.u32.totalorder %s347_s4, %s461_s5 }
 0x11a   :  { %p353_p3 = pnand %p351_p2, %p348_p1 }
 0x11c   :  { %356 = shalt.err (!%p353_p3)
}
 0x11d   :  { %230 = dma.vmem_to_hbm [thread:$0]  %s228_s8, 128, %s461_s5, [#allocation4]  }
 0x11e   :  { %361 = dma.done.wait [#allocation4], 128  }
 0x11f   :  { %362 = vsyncadd [#allocation4], 4294967168 }
 0x120   :  { %234 = vsyncpa [#allocation3], 1 }
 0x121   :  { %235 = vsyncpa [#allocation6], 1 }
 0x122   :  { %236 = vsyncpa [#allocation4], 1 }

</bundles_post_ra>
